<compile_context>
chip_gen: v7x
topology: tpu7x:2x2x1
jax: 0.10.0
libtpu: 0.0.40
codegen_flags: <defaults>
</compile_context>

<pallas_src>
import functools

import jax
import jax.numpy as jnp
import numpy as np
from jax.experimental import pallas as pl
from jax.experimental.pallas import tpu as pltpu


# ----------------------------------------------------------------------------------
# shared cusp-polynomial coefficient formula (works on numpy and jnp arrays)
# ----------------------------------------------------------------------------------
def _fit_cusp_poly_coeffs(rc, X1, X2, X3, X4, X5):
    X1_m_X5 = X1 - X5
    X2_2_m_X3 = X2 ** 2 - X3
    rc_2, rc_3, rc_4 = rc ** 2, rc ** 3, rc ** 4
    a0 = X5
    a1 = X4
    a2 = -X2_2_m_X3 / 2 - 3 * (X2 + X4) / rc + 6 * X1_m_X5 / rc_2
    a3 = X2_2_m_X3 / rc + (5 * X2 + 3 * X4) / rc_2 - 8 * X1_m_X5 / rc_3
    a4 = -X2_2_m_X3 / (2 * rc_2) - (2 * X2 + X4) / rc_3 + 3 * X1_m_X5 / rc_4
    return a0, a1, a2, a3, a4


# ----------------------------------------------------------------------------------
# tile-size selection (shared by both kernels)
# ----------------------------------------------------------------------------------
def _vmem_budget_bytes():
    """Conservative double-buffered working-set budget, safe under every generation's
    default scoped VMEM limit (v5e 16 MiB / v6e 32 MiB / v7x 32 MiB scoped)."""
    try:
        cap = int(pltpu.get_tpu_info().vmem_capacity_bytes)
        return max(4 << 20, min(cap // 5, 14 << 20))
    except Exception:
        return 12 << 20


def _pick_tile_lanes(B, requested, bytes_per_lane):
    """Lane-tile size: multiple of 128, capped by the VMEM budget (double-buffered),
    and capped at ceil(B/2) so the grid has >= 2 steps (v7x dual-TC sharding)."""
    B = int(B)
    if B <= 128:
        return B                                    # single full-extent block
    budget = _vmem_budget_bytes()
    cap = max(128, (budget // (2 * int(bytes_per_lane))) // 128 * 128)
    tl = min(int(requested), B, cap)
    half = -(-B // 2)                               # ceil(B / 2)
    half = -(-half // 128) * 128                    # rounded up to lane granule
    tl = min(tl, half)
    return max(128, (tl // 128) * 128)


# ----------------------------------------------------------------------------------
# Part 1: CuspCorrection
# ----------------------------------------------------------------------------------
def _fit_cusp_params(charges, rc, shifts, phi_gto_boundary, mos0, eps):
    """Dense (8, n_orb, M) fit of the torch _fit_cusp_poly (parameter-sized -> plain
    JAX). Plane order: [C, sgn, a0, a1, a2, a3, a4, rc2_eff]; entries without an
    s-part are sanitized to 0, and rc2_eff = rc^2 where s-part else -1 so a single
    compare (nearest < rc2_eff) reproduces `maybe_corrected & has_s_part`."""
    f32 = jnp.float32
    b = phi_gto_boundary.astype(f32)
    phi0b, phi, dphi, d2phi = b[0], b[1], b[2], b[3]
    mos0 = mos0.astype(f32)
    shifts = shifts.astype(f32)
    charges_c = charges.astype(f32)[:, None]
    rc_c = rc.astype(f32)[:, None]

    has_s = jnp.abs(phi0b) > eps
    phi0 = phi0b * (1.0 + shifts)
    sgn = jnp.sign(phi0)
    C = jnp.where((sgn == jnp.sign(phi)) & (jnp.abs(phi0) < jnp.abs(phi)),
                  2.0 * phi0 - phi, 2.0 * phi - phi0)
    den1 = jnp.where(has_s, phi - C, 1.0)       # safe denominators for masked entries
    den2 = jnp.where(has_s, phi0 - C, 1.0)
    X1 = jnp.log(jnp.abs(den1))
    X2 = dphi / den1
    X3 = d2phi / den1
    X4 = -charges_c * (mos0 + phi0 * shifts) / den2
    X5 = jnp.log(jnp.abs(den2))
    a0, a1, a2, a3, a4 = _fit_cusp_poly_coeffs(rc_c, X1, X2, X3, X4, X5)

    zero = jnp.zeros_like(C)
    clean = lambda x: jnp.where(has_s, x, zero)
    rc2_eff = jnp.where(has_s, jnp.broadcast_to(rc_c * rc_c, C.shape), -1.0)
    planes = jnp.stack(
        [clean(C), clean(sgn), clean(a0), clean(a1), clean(a2), clean(a3), clean(a4),
         rc2_eff],
        axis=0,
    )                                            # (8, M, n_orb)
    return jnp.swapaxes(planes, 1, 2)            # (8, n_orb, M): columns = nuclei


def _cusp_correction_kernel(rs2_ref, params_ref, corr_ref, ci_ref, phi_ref,
                            *, n_nuc, n_orb):
    """One lane-tile (batch on lanes) of CuspCorrection.forward.

    rs2_ref:    (n_nuc, tl)        squared electron-nucleus distances
    params_ref: (8, n_orb, n_nuc)  [C, sgn, a0..a4, rc2_eff]  (VMEM-resident)
    corr_ref:   (n_orb, tl) int8   Output1 (corrected mask), lane-dense
    ci_ref:     (1, tl)     int32  Output2 (nearest-nucleus index), lane-dense
    phi_ref:    (n_orb, tl) f32    Output3 dense (0 where not corrected), lane-dense
    """
    f32 = jnp.float32
    tl = rs2_ref.shape[-1]

    # per-nucleus distance rows: full-lane vregs, VPU mins instead of XLU lane-reduce
    rows = [rs2_ref[i:i + 1, :].astype(f32) for i in range(n_nuc)]     # n_nuc x (1, tl)
    nearest = rows[0]
    for i in range(1, n_nuc):
        nearest = jnp.minimum(nearest, rows[i])

    # first-occurrence argmin (matches torch.min(dim=-1) indices); a NaN distance row
    # never matches -> cif stays n_nuc and that element ends up uncorrected (phi = 0).
    cif = jnp.full(nearest.shape, float(n_nuc), f32)
    for i in range(n_nuc - 1, -1, -1):
        cif = jnp.where(rows[i] == nearest, float(i), cif)

    # selection masks, pre-broadcast once (JAX does not CSE broadcast_in_dim)
    sel = [jnp.broadcast_to(cif == float(i), (n_orb, tl)) for i in range(n_nuc - 1)]

    P = params_ref[...].astype(f32)              # (8, n_orb, n_nuc), tiny

    def at_center(k):                            # gather plane k at the nearest nucleus
        out = P[k, :, n_nuc - 1:n_nuc]           # (n_orb, 1) last-nucleus column
        for i in range(n_nuc - 2, -1, -1):
            out = jnp.where(sel[i], P[k, :, i:i + 1], out)
        return out                               # (n_orb, tl) (or (n_orb,1) if n_nuc==1)

    C, sgn, a0, a1, a2, a3, a4, rc2_eff = [at_center(k) for k in range(8)]

    r = jnp.sqrt(nearest)                        # (1, tl)
    rb = jnp.broadcast_to(r, (n_orb, tl))        # hoisted sublane broadcast
    poly = a0 + rb * (a1 + rb * (a2 + rb * (a3 + rb * a4)))   # Horner, VPU
    phi = C + sgn * jnp.exp(poly)                # exp on EUP
    corrected = nearest < rc2_eff                # folds rc^2 cutoff and has-s-part test

    corr_ref[...] = corrected.astype(corr_ref.dtype)
    ci_ref[...] = cif.astype(jnp.int32)
    phi_ref[...] = jnp.where(corrected, phi, 0.0).astype(phi_ref.dtype)


def cusp_correction_forward(rs_2, phi_gto_boundary, mos0, *, charges, rc, shifts,
                            eps=1e-6, tile_lanes=32768):
    """Pallas TPU implementation of CuspCorrection.forward.

    Returns (corrected bool (*, N_orb), center_idx int32 (*,), phi_cusped_dense
    (*, N_orb)); the torch module's flattened Output3 equals phi_dense[corrected].

    The kernel itself works in a batch-on-lanes layout ((n_nuc, B) in, (n_orb, B) /
    (1, B) out); the wrapper-side transposes are layout plumbing only — producers /
    consumers that can use the orbital-major layout directly should do so."""
    *lead, n_nuc = rs_2.shape
    n_orb = mos0.shape[-1]
    params = _fit_cusp_params(charges, rc, shifts, phi_gto_boundary, mos0, eps)

    rs2_t = rs_2.reshape(-1, n_nuc).astype(jnp.float32).T      # (n_nuc, B)
    B = rs2_t.shape[1]

    # bytes of HBM moved per batch element (input row + all output rows)
    bytes_per_lane = 4 * n_nuc + 4 * n_orb + 1 * n_orb + 4
    tl = _pick_tile_lanes(B, tile_lanes, bytes_per_lane)
    grid = (pl.cdiv(B, tl),)          # no padding copy; ragged tail handled by Pallas

    cost = pl.CostEstimate(
        flops=int(B) * n_orb * 20,
        transcendentals=int(B) * (n_orb + 1),
        bytes_accessed=int(B) * bytes_per_lane + int(params.size) * 4,
    )

    corr_t, ci, phi_t = pl.pallas_call(
        functools.partial(_cusp_correction_kernel, n_nuc=n_nuc, n_orb=n_orb),
        out_shape=(
            jax.ShapeDtypeStruct((n_orb, B), jnp.int8),
            jax.ShapeDtypeStruct((1, B), jnp.int32),
            jax.ShapeDtypeStruct((n_orb, B), jnp.float32),
        ),
        grid=grid,
        in_specs=[
            pl.BlockSpec((n_nuc, tl), lambda i: (0, i)),
            # constant block index -> parameter planes stay VMEM-resident across steps
            pl.BlockSpec((8, n_orb, n_nuc), lambda i: (0, 0, 0)),
        ],
        out_specs=(
            pl.BlockSpec((n_orb, tl), lambda i: (0, i)),
            pl.BlockSpec((1, tl), lambda i: (0, i)),
            pl.BlockSpec((n_orb, tl), lambda i: (0, i)),
        ),
        compiler_params=pltpu.CompilerParams(dimension_semantics=("parallel",)),
        cost_estimate=cost,
    )(rs2_t, params)

    corrected = (corr_t > 0).T.reshape(*lead, n_orb)
    center_idx = ci[0].reshape(tuple(lead))
    phi_dense = phi_t.T.reshape(*lead, n_orb)
    return corrected, center_idx, phi_dense


# ----------------------------------------------------------------------------------
# Part 2: ElectronicAsymptotic (electron-electron cusp Jastrow)
# ----------------------------------------------------------------------------------
def _pairwise_cusp_kernel(d_ref, o_ref, *, neg_scale, alpha):
    d = d_ref[...].astype(jnp.float32)          # (n_pair, tl), f32 accumulation
    y = 1.0 + alpha * d
    inv = pl.reciprocal(y, approx=True)         # EUP slot
    inv = inv * (2.0 - y * inv)                 # one Newton step -> ~full f32 accuracy
    s = jnp.sum(inv, axis=0, keepdims=True)     # pair-axis (sublane) reduction
    o_ref[...] = (neg_scale * s).astype(o_ref.dtype)   # lane-dense (1, tl) store


def electronic_asymptotic(dists_t, *, cusp, alpha=1.0, tile_lanes=32768):
    """gamma = -(cusp / (alpha*(1+alpha*d))).sum over pairs.

    dists_t has the pair axis leading (sublanes) and the batch on the TPU lane axis;
    produce it in this layout directly (no standalone transpose needed)."""
    n_pair = dists_t.shape[0]
    batch_dims = dists_t.shape[1:]
    d2 = dists_t.reshape(n_pair, -1)
    B = d2.shape[1]
    bytes_per_lane = jnp.dtype(d2.dtype).itemsize * n_pair + 4
    tl = _pick_tile_lanes(B, tile_lanes, bytes_per_lane)
    grid = (pl.cdiv(B, tl),)                    # no padding copy
    neg_scale = -(float(cusp) / float(alpha))   # folded at trace time

    cost = pl.CostEstimate(
        flops=4 * n_pair * int(B),
        transcendentals=n_pair * int(B),
        bytes_accessed=int(B) * int(bytes_per_lane),
    )

    out = pl.pallas_call(
        functools.partial(_pairwise_cusp_kernel, neg_scale=neg_scale, alpha=float(alpha)),
        out_shape=jax.ShapeDtypeStruct((1, B), jnp.float32),
        grid=grid,
        in_specs=[pl.BlockSpec((n_pair, tl), lambda i: (0, i))],
        out_specs=pl.BlockSpec((1, tl), lambda i: (0, i)),
        compiler_params=pltpu.CompilerParams(dimension_semantics=("parallel",)),
        cost_estimate=cost,
    )(d2)
    return out[0].reshape(batch_dims)


# ----------------------------------------------------------------------------------
# numpy references (mirror the torch code, float64)
# ----------------------------------------------------------------------------------
def cusp_correction_ref(rs_2, phi_gto_boundary, mos0, *, charges, rc, shifts, eps=1e-6):
    rs_2 = np.asarray(rs_2, np.float64)
    bnd = np.asarray(phi_gto_boundary, np.float64)
    mos0 = np.asarray(mos0, np.float64)
    charges = np.asarray(charges, np.float64)
    rc = np.asarray(rc, np.float64)
    shifts = np.asarray(shifts, np.float64)
    M, n_orb = mos0.shape
    lead = rs_2.shape[:-1]
    rs2 = rs_2.reshape(-1, M)

    has_s = np.abs(bnd[0]) > eps
    charges_e = np.broadcast_to(charges[:, None], (M, n_orb))
    rc_e = np.broadcast_to(rc[:, None], (M, n_orb))
    phi0b, phi, dphi, d2phi = (bnd[k][has_s] for k in range(4))
    sh = shifts[has_s]
    m0 = mos0[has_s]
    Z = charges_e[has_s]
    rcm = rc_e[has_s]

    phi0 = phi0b * (1 + sh)
    sgn = np.sign(phi0)
    C = np.where((sgn == np.sign(phi)) & (np.abs(phi0) < np.abs(phi)),
                 2 * phi0 - phi, 2 * phi - phi0)
    pmc = phi - C
    X1 = np.log(np.abs(pmc))
    X2 = dphi / pmc
    X3 = d2phi / pmc
    X4 = -Z * (m0 + phi0 * sh) / (phi0 - C)
    X5 = np.log(np.abs(phi0 - C))
    a0, a1, a2, a3, a4 = _fit_cusp_poly_coeffs(rcm, X1, X2, X3, X4, X5)

    nearest = rs2.min(axis=-1)
    center_idx = rs2.argmin(axis=-1)
    maybe = nearest < rc[center_idx] ** 2
    rs1 = np.sqrt(nearest[maybe])
    corrected = maybe[:, None] & has_s[center_idx]
    params_idx = np.empty(has_s.shape, dtype=np.int64)
    params_idx[has_s] = np.arange(int(has_s.sum()))
    rs1_idx = np.broadcast_to(np.arange(len(rs1))[:, None],
                              (len(rs1), n_orb))[corrected[maybe]]
    sel = params_idx[center_idx][corrected]
    Cc, sgc, b0, b1, b2, b3, b4 = np.stack([C, sgn, a0, a1, a2, a3, a4])[:, sel]
    rr = rs1[rs1_idx]
    phi_cusped = Cc + sgc * np.exp(b0 + b1 * rr + b2 * rr ** 2 + b3 * rr ** 3 + b4 * rr ** 4)
    return corrected.reshape(*lead, n_orb), center_idx.reshape(lead), phi_cusped


def electronic_asymptotic_ref(dists_t, *, cusp, alpha=1.0):
    d = np.asarray(dists_t, np.float64)
    return -(cusp / (alpha * (1.0 + alpha * d))).sum(axis=0)


# ----------------------------------------------------------------------------------
if __name__ == "__main__":
    key = jax.random.PRNGKey(0)
    k = jax.random.split(key, 8)

    # --- CuspCorrection demo: M=3 nuclei, N_orb=8 orbitals, batch (*) = (4, 80) ---
    # B = 320 -> the >=2-step cap yields two lane-tiles (256 + ragged 64), exercising
    # the multi-step grid and the masked ragged tail without any padding copy.
    M, n_orb = 3, 8
    lead = (4, 80)

    charges = jnp.array([1.0, 2.0, 3.0], jnp.float32)
    rc = jax.random.uniform(k[0], (M,), jnp.float32, 0.35, 0.5)
    shifts = 0.02 * jax.random.uniform(k[1], (M, n_orb), jnp.float32, -1.0, 1.0)

    # physically sensible s-type boundary data from s(r) = c * exp(-z r)
    sign_c = jnp.where(jax.random.bernoulli(k[2], 0.5, (M, n_orb)), 1.0, -1.0)
    c = sign_c * jax.random.uniform(k[3], (M, n_orb), jnp.float32, 0.7, 1.3)
    z = jax.random.uniform(k[4], (M, n_orb), jnp.float32, 1.0, 2.0)
    e = jnp.exp(-z * rc[:, None])
    phi_gto_boundary = jnp.stack([c, c * e, -z * c * e, z * z * c * e], axis=0)  # (4, M, N)
    phi_gto_boundary = phi_gto_boundary.at[0, 0, 3].set(0.0)  # an orbital with no s-part
    mos0 = c * jax.random.uniform(k[5], (M, n_orb), jnp.float32, 0.9, 1.1)

    r_en = jax.random.uniform(k[6], lead + (M,), jnp.float32, 0.05, 1.0)
    rs_2 = r_en ** 2

    corrected, center_idx, phi_dense = cusp_correction_forward(
        rs_2, phi_gto_boundary, mos0, charges=charges, rc=rc, shifts=shifts, eps=1e-6)
    jax.block_until_ready((corrected, center_idx, phi_dense))

    corr_ref, ci_ref, phi_flat_ref = cusp_correction_ref(
        rs_2, phi_gto_boundary, mos0, charges=charges, rc=rc, shifts=shifts, eps=1e-6)

    assert corrected.shape == lead + (n_orb,), corrected.shape
    assert center_idx.shape == lead, center_idx.shape
    np.testing.assert_array_equal(np.asarray(corrected), corr_ref)
    np.testing.assert_array_equal(np.asarray(center_idx), ci_ref)
    phi_flat = np.asarray(phi_dense)[np.asarray(corrected)]   # torch's flattened Output3
    np.testing.assert_allclose(phi_flat, phi_flat_ref, rtol=1e-3, atol=1e-4)

    # --- ElectronicAsymptotic demo: pair axis leading, batch on lanes -------------
    n_pair, bflat = 28, 512
    dists_t = jax.random.uniform(k[7], (n_pair, bflat), jnp.float32, 0.1, 5.0)
    gamma = electronic_asymptotic(dists_t, cusp=0.25, alpha=1.0, tile_lanes=256)
    gamma = jax.block_until_ready(gamma)
    gamma_ref = electronic_asymptotic_ref(dists_t, cusp=0.25, alpha=1.0)
    np.testing.assert_allclose(np.asarray(gamma), gamma_ref, rtol=1e-5, atol=1e-6)

    print("KERNEL_OK")
</pallas_src>

<mosaic_0001>
module attributes {stable_mosaic.version = 11 : i64} {
  func.func @_cusp_correction_kernel(%arg0: i32, %arg1: memref<3x256xf32, #tpu.memory_space<vmem>>, %arg2: memref<8x8x3xf32, #tpu.memory_space<vmem>>, %arg3: memref<8x256xi8, #tpu.memory_space<vmem>>, %arg4: memref<1x256xi32, #tpu.memory_space<vmem>>, %arg5: memref<8x256xf32, #tpu.memory_space<vmem>>) attributes {dimension_semantics = [#tpu.dimension_semantics<parallel>], iteration_bounds = array<i64: 2>, scalar_prefetch = 0 : i64, scratch_operands = 0 : i64, tpu.core_type = #tpu.core_type<tc>, window_params = [{transform_indices = @transform_0, window_bounds = array<i64: 3, 256>}, {pipeline_mode = #tpu.pipeline_mode<synchronous>, transform_indices = @transform_1, window_bounds = array<i64: 8, 8, 3>}, {transform_indices = @transform_2, window_bounds = array<i64: 8, 256>}, {transform_indices = @transform_3, window_bounds = array<i64: 1, 256>}, {transform_indices = @transform_4, window_bounds = array<i64: 8, 256>}]} {
    %c0 = arith.constant 0 : index
    %c0_0 = arith.constant 0 : index
    %0 = vector.load %arg1[%c0, %c0_0] : memref<3x256xf32, #tpu.memory_space<vmem>>, vector<1x256xf32>
    %c1 = arith.constant 1 : index
    %c0_1 = arith.constant 0 : index
    %1 = vector.load %arg1[%c1, %c0_1] : memref<3x256xf32, #tpu.memory_space<vmem>>, vector<1x256xf32>
    %c2 = arith.constant 2 : index
    %c0_2 = arith.constant 0 : index
    %2 = vector.load %arg1[%c2, %c0_2] : memref<3x256xf32, #tpu.memory_space<vmem>>, vector<1x256xf32>
    %3 = arith.minimumf %0, %1 : vector<1x256xf32>
    %4 = arith.minimumf %3, %2 : vector<1x256xf32>
    %cst = arith.constant 3.000000e+00 : f32
    %5 = vector.broadcast %cst : f32 to vector<1x256xf32>
    %6 = arith.cmpf oeq, %2, %4 : vector<1x256xf32>
    %cst_3 = arith.constant 2.000000e+00 : f32
    %7 = vector.broadcast %cst_3 : f32 to vector<1x256xf32>
    %8 = arith.select %6, %7, %5 : vector<1x256xi1>, vector<1x256xf32>
    %9 = arith.cmpf oeq, %1, %4 : vector<1x256xf32>
    %cst_4 = arith.constant 1.000000e+00 : f32
    %10 = vector.broadcast %cst_4 : f32 to vector<1x256xf32>
    %11 = arith.select %9, %10, %8 : vector<1x256xi1>, vector<1x256xf32>
    %12 = arith.cmpf oeq, %0, %4 : vector<1x256xf32>
    %cst_5 = arith.constant 0.000000e+00 : f32
    %13 = vector.broadcast %cst_5 : f32 to vector<1x256xf32>
    %14 = arith.select %12, %13, %11 : vector<1x256xi1>, vector<1x256xf32>
    %cst_6 = arith.constant 0.000000e+00 : f32
    %15 = vector.broadcast %cst_6 : f32 to vector<1x256xf32>
    %16 = arith.cmpf oeq, %14, %15 : vector<1x256xf32>
    %17 = vector.shape_cast %16 : vector<1x256xi1> to vector<1x256xi1>
    %18 = vector.broadcast %17 : vector<1x256xi1> to vector<8x256xi1>
    %cst_7 = arith.constant 1.000000e+00 : f32
    %19 = vector.broadcast %cst_7 : f32 to vector<1x256xf32>
    %20 = arith.cmpf oeq, %14, %19 : vector<1x256xf32>
    %21 = vector.shape_cast %20 : vector<1x256xi1> to vector<1x256xi1>
    %22 = vector.broadcast %21 : vector<1x256xi1> to vector<8x256xi1>
    %c0_8 = arith.constant 0 : index
    %c0_9 = arith.constant 0 : index
    %c0_10 = arith.constant 0 : index
    %23 = vector.load %arg2[%c0_8, %c0_9, %c0_10] : memref<8x8x3xf32, #tpu.memory_space<vmem>>, vector<8x8x3xf32>
    %24 = vector.extract_strided_slice %23 {offsets = [0, 0, 2], sizes = [1, 8, 1], strides = [1, 1, 1]} : vector<8x8x3xf32> to vector<1x8x1xf32>
    %25 = vector.shape_cast %24 : vector<1x8x1xf32> to vector<8x1xf32>
    %26 = vector.extract_strided_slice %23 {offsets = [0, 0, 1], sizes = [1, 8, 1], strides = [1, 1, 1]} : vector<8x8x3xf32> to vector<1x8x1xf32>
    %27 = vector.shape_cast %26 : vector<1x8x1xf32> to vector<8x1xf32>
    %28 = vector.shape_cast %27 : vector<8x1xf32> to vector<8x1xf32>
    %29 = vector.broadcast %28 : vector<8x1xf32> to vector<8x256xf32>
    %30 = vector.shape_cast %25 : vector<8x1xf32> to vector<8x1xf32>
    %31 = vector.broadcast %30 : vector<8x1xf32> to vector<8x256xf32>
    %32 = arith.select %22, %29, %31 : vector<8x256xi1>, vector<8x256xf32>
    %33 = vector.extract_strided_slice %23 {offsets = [0, 0, 0], sizes = [1, 8, 1], strides = [1, 1, 1]} : vector<8x8x3xf32> to vector<1x8x1xf32>
    %34 = vector.shape_cast %33 : vector<1x8x1xf32> to vector<8x1xf32>
    %35 = vector.shape_cast %34 : vector<8x1xf32> to vector<8x1xf32>
    %36 = vector.broadcast %35 : vector<8x1xf32> to vector<8x256xf32>
    %37 = arith.select %18, %36, %32 : vector<8x256xi1>, vector<8x256xf32>
    %38 = vector.extract_strided_slice %23 {offsets = [1, 0, 2], sizes = [1, 8, 1], strides = [1, 1, 1]} : vector<8x8x3xf32> to vector<1x8x1xf32>
    %39 = vector.shape_cast %38 : vector<1x8x1xf32> to vector<8x1xf32>
    %40 = vector.extract_strided_slice %23 {offsets = [1, 0, 1], sizes = [1, 8, 1], strides = [1, 1, 1]} : vector<8x8x3xf32> to vector<1x8x1xf32>
    %41 = vector.shape_cast %40 : vector<1x8x1xf32> to vector<8x1xf32>
    %42 = vector.shape_cast %41 : vector<8x1xf32> to vector<8x1xf32>
    %43 = vector.broadcast %42 : vector<8x1xf32> to vector<8x256xf32>
    %44 = vector.shape_cast %39 : vector<8x1xf32> to vector<8x1xf32>
    %45 = vector.broadcast %44 : vector<8x1xf32> to vector<8x256xf32>
    %46 = arith.select %22, %43, %45 : vector<8x256xi1>, vector<8x256xf32>
    %47 = vector.extract_strided_slice %23 {offsets = [1, 0, 0], sizes = [1, 8, 1], strides = [1, 1, 1]} : vector<8x8x3xf32> to vector<1x8x1xf32>
    %48 = vector.shape_cast %47 : vector<1x8x1xf32> to vector<8x1xf32>
    %49 = vector.shape_cast %48 : vector<8x1xf32> to vector<8x1xf32>
    %50 = vector.broadcast %49 : vector<8x1xf32> to vector<8x256xf32>
    %51 = arith.select %18, %50, %46 : vector<8x256xi1>, vector<8x256xf32>
    %52 = vector.extract_strided_slice %23 {offsets = [2, 0, 2], sizes = [1, 8, 1], strides = [1, 1, 1]} : vector<8x8x3xf32> to vector<1x8x1xf32>
    %53 = vector.shape_cast %52 : vector<1x8x1xf32> to vector<8x1xf32>
    %54 = vector.extract_strided_slice %23 {offsets = [2, 0, 1], sizes = [1, 8, 1], strides = [1, 1, 1]} : vector<8x8x3xf32> to vector<1x8x1xf32>
    %55 = vector.shape_cast %54 : vector<1x8x1xf32> to vector<8x1xf32>
    %56 = vector.shape_cast %55 : vector<8x1xf32> to vector<8x1xf32>
    %57 = vector.broadcast %56 : vector<8x1xf32> to vector<8x256xf32>
    %58 = vector.shape_cast %53 : vector<8x1xf32> to vector<8x1xf32>
    %59 = vector.broadcast %58 : vector<8x1xf32> to vector<8x256xf32>
    %60 = arith.select %22, %57, %59 : vector<8x256xi1>, vector<8x256xf32>
    %61 = vector.extract_strided_slice %23 {offsets = [2, 0, 0], sizes = [1, 8, 1], strides = [1, 1, 1]} : vector<8x8x3xf32> to vector<1x8x1xf32>
    %62 = vector.shape_cast %61 : vector<1x8x1xf32> to vector<8x1xf32>
    %63 = vector.shape_cast %62 : vector<8x1xf32> to vector<8x1xf32>
    %64 = vector.broadcast %63 : vector<8x1xf32> to vector<8x256xf32>
    %65 = arith.select %18, %64, %60 : vector<8x256xi1>, vector<8x256xf32>
    %66 = vector.extract_strided_slice %23 {offsets = [3, 0, 2], sizes = [1, 8, 1], strides = [1, 1, 1]} : vector<8x8x3xf32> to vector<1x8x1xf32>
    %67 = vector.shape_cast %66 : vector<1x8x1xf32> to vector<8x1xf32>
    %68 = vector.extract_strided_slice %23 {offsets = [3, 0, 1], sizes = [1, 8, 1], strides = [1, 1, 1]} : vector<8x8x3xf32> to vector<1x8x1xf32>
    %69 = vector.shape_cast %68 : vector<1x8x1xf32> to vector<8x1xf32>
    %70 = vector.shape_cast %69 : vector<8x1xf32> to vector<8x1xf32>
    %71 = vector.broadcast %70 : vector<8x1xf32> to vector<8x256xf32>
    %72 = vector.shape_cast %67 : vector<8x1xf32> to vector<8x1xf32>
    %73 = vector.broadcast %72 : vector<8x1xf32> to vector<8x256xf32>
    %74 = arith.select %22, %71, %73 : vector<8x256xi1>, vector<8x256xf32>
    %75 = vector.extract_strided_slice %23 {offsets = [3, 0, 0], sizes = [1, 8, 1], strides = [1, 1, 1]} : vector<8x8x3xf32> to vector<1x8x1xf32>
    %76 = vector.shape_cast %75 : vector<1x8x1xf32> to vector<8x1xf32>
    %77 = vector.shape_cast %76 : vector<8x1xf32> to vector<8x1xf32>
    %78 = vector.broadcast %77 : vector<8x1xf32> to vector<8x256xf32>
    %79 = arith.select %18, %78, %74 : vector<8x256xi1>, vector<8x256xf32>
    %80 = vector.extract_strided_slice %23 {offsets = [4, 0, 2], sizes = [1, 8, 1], strides = [1, 1, 1]} : vector<8x8x3xf32> to vector<1x8x1xf32>
    %81 = vector.shape_cast %80 : vector<1x8x1xf32> to vector<8x1xf32>
    %82 = vector.extract_strided_slice %23 {offsets = [4, 0, 1], sizes = [1, 8, 1], strides = [1, 1, 1]} : vector<8x8x3xf32> to vector<1x8x1xf32>
    %83 = vector.shape_cast %82 : vector<1x8x1xf32> to vector<8x1xf32>
    %84 = vector.shape_cast %83 : vector<8x1xf32> to vector<8x1xf32>
    %85 = vector.broadcast %84 : vector<8x1xf32> to vector<8x256xf32>
    %86 = vector.shape_cast %81 : vector<8x1xf32> to vector<8x1xf32>
    %87 = vector.broadcast %86 : vector<8x1xf32> to vector<8x256xf32>
    %88 = arith.select %22, %85, %87 : vector<8x256xi1>, vector<8x256xf32>
    %89 = vector.extract_strided_slice %23 {offsets = [4, 0, 0], sizes = [1, 8, 1], strides = [1, 1, 1]} : vector<8x8x3xf32> to vector<1x8x1xf32>
    %90 = vector.shape_cast %89 : vector<1x8x1xf32> to vector<8x1xf32>
    %91 = vector.shape_cast %90 : vector<8x1xf32> to vector<8x1xf32>
    %92 = vector.broadcast %91 : vector<8x1xf32> to vector<8x256xf32>
    %93 = arith.select %18, %92, %88 : vector<8x256xi1>, vector<8x256xf32>
    %94 = vector.extract_strided_slice %23 {offsets = [5, 0, 2], sizes = [1, 8, 1], strides = [1, 1, 1]} : vector<8x8x3xf32> to vector<1x8x1xf32>
    %95 = vector.shape_cast %94 : vector<1x8x1xf32> to vector<8x1xf32>
    %96 = vector.extract_strided_slice %23 {offsets = [5, 0, 1], sizes = [1, 8, 1], strides = [1, 1, 1]} : vector<8x8x3xf32> to vector<1x8x1xf32>
    %97 = vector.shape_cast %96 : vector<1x8x1xf32> to vector<8x1xf32>
    %98 = vector.shape_cast %97 : vector<8x1xf32> to vector<8x1xf32>
    %99 = vector.broadcast %98 : vector<8x1xf32> to vector<8x256xf32>
    %100 = vector.shape_cast %95 : vector<8x1xf32> to vector<8x1xf32>
    %101 = vector.broadcast %100 : vector<8x1xf32> to vector<8x256xf32>
    %102 = arith.select %22, %99, %101 : vector<8x256xi1>, vector<8x256xf32>
    %103 = vector.extract_strided_slice %23 {offsets = [5, 0, 0], sizes = [1, 8, 1], strides = [1, 1, 1]} : vector<8x8x3xf32> to vector<1x8x1xf32>
    %104 = vector.shape_cast %103 : vector<1x8x1xf32> to vector<8x1xf32>
    %105 = vector.shape_cast %104 : vector<8x1xf32> to vector<8x1xf32>
    %106 = vector.broadcast %105 : vector<8x1xf32> to vector<8x256xf32>
    %107 = arith.select %18, %106, %102 : vector<8x256xi1>, vector<8x256xf32>
    %108 = vector.extract_strided_slice %23 {offsets = [6, 0, 2], sizes = [1, 8, 1], strides = [1, 1, 1]} : vector<8x8x3xf32> to vector<1x8x1xf32>
    %109 = vector.shape_cast %108 : vector<1x8x1xf32> to vector<8x1xf32>
    %110 = vector.extract_strided_slice %23 {offsets = [6, 0, 1], sizes = [1, 8, 1], strides = [1, 1, 1]} : vector<8x8x3xf32> to vector<1x8x1xf32>
    %111 = vector.shape_cast %110 : vector<1x8x1xf32> to vector<8x1xf32>
    %112 = vector.shape_cast %111 : vector<8x1xf32> to vector<8x1xf32>
    %113 = vector.broadcast %112 : vector<8x1xf32> to vector<8x256xf32>
    %114 = vector.shape_cast %109 : vector<8x1xf32> to vector<8x1xf32>
    %115 = vector.broadcast %114 : vector<8x1xf32> to vector<8x256xf32>
    %116 = arith.select %22, %113, %115 : vector<8x256xi1>, vector<8x256xf32>
    %117 = vector.extract_strided_slice %23 {offsets = [6, 0, 0], sizes = [1, 8, 1], strides = [1, 1, 1]} : vector<8x8x3xf32> to vector<1x8x1xf32>
    %118 = vector.shape_cast %117 : vector<1x8x1xf32> to vector<8x1xf32>
    %119 = vector.shape_cast %118 : vector<8x1xf32> to vector<8x1xf32>
    %120 = vector.broadcast %119 : vector<8x1xf32> to vector<8x256xf32>
    %121 = arith.select %18, %120, %116 : vector<8x256xi1>, vector<8x256xf32>
    %122 = vector.extract_strided_slice %23 {offsets = [7, 0, 2], sizes = [1, 8, 1], strides = [1, 1, 1]} : vector<8x8x3xf32> to vector<1x8x1xf32>
    %123 = vector.shape_cast %122 : vector<1x8x1xf32> to vector<8x1xf32>
    %124 = vector.extract_strided_slice %23 {offsets = [7, 0, 1], sizes = [1, 8, 1], strides = [1, 1, 1]} : vector<8x8x3xf32> to vector<1x8x1xf32>
    %125 = vector.shape_cast %124 : vector<1x8x1xf32> to vector<8x1xf32>
    %126 = vector.shape_cast %125 : vector<8x1xf32> to vector<8x1xf32>
    %127 = vector.broadcast %126 : vector<8x1xf32> to vector<8x256xf32>
    %128 = vector.shape_cast %123 : vector<8x1xf32> to vector<8x1xf32>
    %129 = vector.broadcast %128 : vector<8x1xf32> to vector<8x256xf32>
    %130 = arith.select %22, %127, %129 : vector<8x256xi1>, vector<8x256xf32>
    %131 = vector.extract_strided_slice %23 {offsets = [7, 0, 0], sizes = [1, 8, 1], strides = [1, 1, 1]} : vector<8x8x3xf32> to vector<1x8x1xf32>
    %132 = vector.shape_cast %131 : vector<1x8x1xf32> to vector<8x1xf32>
    %133 = vector.shape_cast %132 : vector<8x1xf32> to vector<8x1xf32>
    %134 = vector.broadcast %133 : vector<8x1xf32> to vector<8x256xf32>
    %135 = arith.select %18, %134, %130 : vector<8x256xi1>, vector<8x256xf32>
    %136 = math.sqrt %4 : vector<1x256xf32>
    %137 = vector.shape_cast %136 : vector<1x256xf32> to vector<1x256xf32>
    %138 = vector.broadcast %137 : vector<1x256xf32> to vector<8x256xf32>
    %139 = arith.mulf %138, %121 : vector<8x256xf32>
    %140 = arith.addf %107, %139 : vector<8x256xf32>
    %141 = arith.mulf %138, %140 : vector<8x256xf32>
    %142 = arith.addf %93, %141 : vector<8x256xf32>
    %143 = arith.mulf %138, %142 : vector<8x256xf32>
    %144 = arith.addf %79, %143 : vector<8x256xf32>
    %145 = arith.mulf %138, %144 : vector<8x256xf32>
    %146 = arith.addf %65, %145 : vector<8x256xf32>
    %147 = math.exp %146 : vector<8x256xf32>
    %148 = arith.mulf %51, %147 : vector<8x256xf32>
    %149 = arith.addf %37, %148 : vector<8x256xf32>
    %150 = vector.broadcast %4 : vector<1x256xf32> to vector<8x256xf32>
    %151 = arith.cmpf olt, %150, %135 : vector<8x256xf32>
    %152 = arith.extui %151 : vector<8x256xi1> to vector<8x256xi8>
    %c0_11 = arith.constant 0 : index
    %c0_12 = arith.constant 0 : index
    %153 = vector.load %arg3[%c0_11, %c0_12] : memref<8x256xi8, #tpu.memory_space<vmem>>, vector<8x256xi8>
    tpu.vector_store %arg3[%c0_11, %c0_12], %152 {strides = array<i32>} : memref<8x256xi8, #tpu.memory_space<vmem>>, vector<8x256xi8>,
    %154 = arith.fptosi %14 : vector<1x256xf32> to vector<1x256xi32>
    %c0_13 = arith.constant 0 : index
    %c0_14 = arith.constant 0 : index
    %155 = vector.load %arg4[%c0_13, %c0_14] : memref<1x256xi32, #tpu.memory_space<vmem>>, vector<1x256xi32>
    tpu.vector_store %arg4[%c0_13, %c0_14], %154 {strides = array<i32>} : memref<1x256xi32, #tpu.memory_space<vmem>>, vector<1x256xi32>,
    %cst_15 = arith.constant 0.000000e+00 : f32
    %156 = vector.broadcast %cst_15 : f32 to vector<8x256xf32>
    %157 = arith.select %151, %149, %156 : vector<8x256xi1>, vector<8x256xf32>
    %c0_16 = arith.constant 0 : index
    %c0_17 = arith.constant 0 : index
    %158 = vector.load %arg5[%c0_16, %c0_17] : memref<8x256xf32, #tpu.memory_space<vmem>>, vector<8x256xf32>
    tpu.vector_store %arg5[%c0_16, %c0_17], %157 {strides = array<i32>} : memref<8x256xf32, #tpu.memory_space<vmem>>, vector<8x256xf32>,
    return
  }
  func.func @transform_0(%arg0: i32) -> (i32, i32) {
    %c0_i32 = arith.constant 0 : i32
    %c0_i32_0 = arith.constant 0 : i32
    return %c0_i32, %arg0 : i32, i32
  }
  func.func @transform_1(%arg0: i32) -> (i32, i32, i32) {
    %c0_i32 = arith.constant 0 : i32
    %c0_i32_0 = arith.constant 0 : i32
    %c0_i32_1 = arith.constant 0 : i32
    %c0_i32_2 = arith.constant 0 : i32
    return %c0_i32, %c0_i32_0, %c0_i32_1 : i32, i32, i32
  }
  func.func @transform_2(%arg0: i32) -> (i32, i32) {
    %c0_i32 = arith.constant 0 : i32
    %c0_i32_0 = arith.constant 0 : i32
    return %c0_i32, %arg0 : i32, i32
  }
  func.func @transform_3(%arg0: i32) -> (i32, i32) {
    %c0_i32 = arith.constant 0 : i32
    %c0_i32_0 = arith.constant 0 : i32
    return %c0_i32, %arg0 : i32, i32
  }
  func.func @transform_4(%arg0: i32) -> (i32, i32) {
    %c0_i32 = arith.constant 0 : i32
    %c0_i32_0 = arith.constant 0 : i32
    return %c0_i32, %arg0 : i32, i32
  }
}

</mosaic_0001>

<bundles_post_ra>
// kernel: tpu_custom_call.1
= control target key start
LH: loop header
LB: loop body
LE: loop exit
PB: predicated region body
PF: predicated region fallthrough
CT: control target
= control target key end

     0   :  { %10 = vsyncpa [#allocation3], 0  ;;  %s1371_s0 = inlined_call_operand.vmem [shape: f32[3,320], index: 0, kind: input, shape index: {}]   ;;  %s1372_s1 = inlined_call_operand.vmem [shape: f32[8,8,3], index: 1, kind: input, shape index: {}]   ;;  %s1373_s2 = inlined_call_operand.hbm [shape: s8[8,320], index: 2, kind: output, shape index: {0}]   ;;  %s1374_s3 = inlined_call_operand.hbm [shape: s32[1,320], index: 3, kind: output, shape index: {1}]   ;;  %s1375_s4 = inlined_call_operand.hbm [shape: f32[8,320], index: 4, kind: output, shape index: {2}]  }
   0x1   :  { %12 = vsyncpa [#allocation3 + $0x1], 0 }
   0x2   :  { %13 = vsyncpa [#allocation5], 0 }
   0x3   :  { %15 = vsyncpa [#allocation5 + $0x1], 0  ;;  %s968_s15 = smov 0   ;;  %s970_s16 = smov 0  }
   0x4   :  { %s972_s17 = smov 0   ;;  %s974_s18 = smov 0  }
   0x5 LB: > { %s989_s19 = sadd.s32 4294967295, %s934_s18   ;;  %s1376_s20 = sadd.s32 4294967294, %s934_s18   ;;  %s934_s18 = sphi %s974_s18, %s1395_s18   ;;  %s930_s17 = sphi %s972_s17, %s1394_s17   ;;  %s926_s16 = sphi %s970_s16, %s1393_s16   ;;  %s922_s15 = sphi %s968_s15, %s1392_s15  }
   0x6   : > { %s993_s21 = sadd.s32 1, %s934_s18   ;;  %s75_s22 = sadd.s32 1, %s930_s17 }
   0x7   : > { %s72_s23 = ssub.s32 %s934_s18, %s993_s21  ;;  %p85_p0 = scmp.ne.s32.totalorder %s930_s17, %s926_s16 }
   0x8   : > { %p73_p1 = scmp.eq.s32.totalorder %s72_s23, 0  ;;  %p86_p2 = scmp.eq.s32.totalorder %s989_s19, 1 }
   0x9   : > { %p91_p3 = scmp.ne.s32.totalorder %s926_s16, %s922_s15  ;;  %p92_p4 = scmp.eq.s32.totalorder %s1376_s20, 1 }
   0xa   : > { %s1006_s24 = scalar_select %p73_p1, %s930_s17, %s75_s22  }
   0xb   : > { %p1008_p5 = por %p86_p2, %p85_p0  ;;  %p1012_p6 = por %p92_p4, %p91_p3 }
   0xc   : > { %p703_p7 = scmp.ge.s32.totalorder %s934_s18, 1  ;;  %p182_p8 = scmp.lt.s32.totalorder %s934_s18, 3 }
   0xe   : > { %p183_p9 = pnand %p703_p7, %p182_p8 }
   0xf   : > { %v296_v0 = vld [vmem:[%s1372_s1 + $0x30] sm:$0xff] (!%p183_p9)  ;;  %v936_v1 = vmov (!%p183_p9), 1   ;;  %v937_v2 = vmov (!%p183_p9), 0   ;;  %s1024_s29 = sshll.u32 (!%p183_p9), %s989_s19, 1  ;;  %v295_v3 = vld [vmem:[%s1372_s1 + $0x28] sm:$0xff] (!%p183_p9)  ;;  %v294_v4 = vld [vmem:[%s1372_s1 + $0x20] sm:$0xff] (!%p183_p9)  ;;  %v268_v5 = vlaneseq (!%p183_p9) }
  0x10   : > { %186 = sbr.rel (%p183_p9) target bundleno = 311 (0x137), region = 28  ;;  %787 = vset.pattern.permute.xlu0 (!%p183_p9), %v936_v1  ;;  %788 = vset.pattern.permute.xlu1 (!%p183_p9), %v937_v2  ;;  %p227_p10 = scmp.lt.s32.totalorder (!%p183_p9), %s1024_s29, 2  ;;  %v938_v10 = vmov (!%p183_p9), 2   ;;  %v939_v13 = vmov (!%p183_p9), 3.0   ;;  %v293_v19 = vld [vmem:[%s1372_s1 + $0x18] sm:$0xff] (!%p183_p9)  ;;  %v292_v26 = vld [vmem:[%s1372_s1 + $0x10] sm:$0xff] (!%p183_p9) }
  0x11   : > { %402 = vperm.xlu0 (!%p183_p9), %787, %v296_v0   ;;  %412 = vperm.xlu1 (!%p183_p9), %788, %v296_v0   ;;  %v269_v11 = vshrl.u32 (!%p183_p9), %v268_v5, 7  ;;  %v297_v30 = vld [vmem:[%s1372_s1 + $0x38] sm:$0xff] (!%p183_p9)  ;;  %v291_v35 = vld [vmem:[%s1372_s1 + $0x8] sm:$0xff] (!%p183_p9)  ;;  %v290_v36 = vld [vmem:[%s1372_s1] sm:$0xff] (!%p183_p9)  ;;  %vm503_vm7 = vcmp.lt.s32.totalorder (!%p183_p9), %v268_v5, 256  ;;  %s1100_s8 = sand.u32 (!%p183_p9), 1, %s926_s16  }
  0x12   : > { %s705_s9 = sshll.u32 (!%p183_p9), %s1100_s8, 1  ;;  %s515_s11 = sand.u32 (!%p183_p9), 1, %s989_s19  }
  0x13   : > { %v1048_v15 = vsub.s32 (!%p183_p9), 0, %v269_v11  ;;  %v1050_v16 = vsub.s32 (!%p183_p9), 1, %v269_v11  ;;  %s1107_s10 = scalar_lea.vmem (!%p183_p9), [#allocation4], %s705_s9  ;;  %s706_s14 = sshll.u32 (!%p183_p9), %s1100_s8, 4 }
  0x14   : > { %s1233_s22 = scalar_lea.vmem (!%p183_p9), [#allocation6], %s706_s14  ;;  %s511_s23 = scalar_lea.sflag (!%p183_p9), [#allocation3], %s1100_s8 }
  0x15   : > { %791 = vset.pattern.permute.xlu0 (!%p183_p9), %v937_v2  ;;  %789 = vset.pattern.permute.xlu1 (!%p183_p9), %v936_v1  ;;  %s1240_s27 = scalar_lea.sflag (!%p183_p9), [#allocation5], %s515_s11 }
  0x16   : > { %395 = vperm.xlu0 (!%p183_p9), %791, %v295_v3   ;;  %385 = vperm.xlu1 (!%p183_p9), %789, %v295_v3  }
  0x17   : > { %s228_s6 = scalar_select %p227_p10, %s1024_s29, 2 }
  0x18   : > { %s529_s28 = ssub.s32 (%p1008_p5), 3, %s1024_s29 }
  0x19   : > { %s708_s7 = sshll.u32 %s228_s6, 2  ;;  %p530_p11 = scmp.lt.s32.totalorder (%p1008_p5), %s529_s28, 2 }
  0x1a   : > { %s230_s12 = scalar_lea.vmem %s1371_s0, %s708_s7  ;;  %378 = vperm.xlu0 %791, %v294_v4   ;;  %790 = vset.pattern.permute.xlu1 %v938_v10 }
  0x1b   : > { %v253_v6 = vld [vmem:[%s230_s12] ss:$4 sm:$0x3]  ;;  %v709_v7 = vld [vmem:[%s230_s12 + $0x1] ss:$4 sm:$0x3]  ;;  %389 = vperm.xlu1 %790, %v295_v3  }
  0x1c   : > { %v710_v8 = vld [vmem:[%s230_s12 + $0x2] ss:$4 sm:$0x3]  ;;  %v258_v9 = vmin.f32 %v253_v6, %v709_v7  ;;  %s704_s12 = sshll.u32 %s1100_s8, 2 }
  0x1d   : > { %s1217_s13 = scalar_lea.vmem [#allocation2], %s704_s12 }
  0x1e   : > { %v1041_v12 = vmin.f32 %v258_v9, %v710_v8  ;;  %794 = vset.pattern.permute.xlu0 %v938_v10 }
  0x1f   : > { %406 = vperm.xlu0 %794, %v296_v0   ;;  %792 = vset.pattern.permute.xlu1 %v936_v1 }
  0x20   : > { %vm260_vm0 = vcmp.eq.f32.partialorder %v710_v8, %v1041_v12  ;;  %vm262_vm1 = vcmp.eq.f32.partialorder %v709_v7, %v1041_v12  ;;  %vm264_vm2 = vcmp.eq.f32.partialorder %v253_v6, %v1041_v12  ;;  %806 = vrsqrt.f32 %v1041_v12  ;;  %368 = vperm.xlu1 %792, %v294_v4  }
  0x21   : > { %v261_v14 = vsel %vm260_vm0, 2.0, %v939_v13  ;;  %vm436_vm5 = vcmp.eq.f32.partialorder %v1041_v12, inf  ;;  %v439_v28 = vand.u32 2147483648, %v1041_v12  ;;  %vm438_vm6 = vcmp.eq.f32.partialorder %v1041_v12, 0.0 }
  0x22   : > { %v263_v17 = vsel %vm262_vm1, 1.0, %v261_v14  ;;  %v480_v39 = vrot.slane %v1041_v12, %v1048_v15  ;;  %v484_v40 = vrot.slane %v1041_v12, %v1050_v16 }
  0x23   : > { %v265_v18 = vsel %vm264_vm2, 0.0, %v263_v17  ;;  %355 = vperm.xlu0 %794, %v293_v19  }
  0x24   : > { %vm266_vm3 = vcmp.eq.f32.partialorder %v265_v18, 0.0  ;;  %vm278_vm4 = vcmp.eq.f32.partialorder %v265_v18, 1.0  ;;  %793 = vset.pattern.permute.xlu1 %v938_v10  ;;  %v735_v37 = vtrunc.f32 %v265_v18 }
  0x25   : > { %v1057_v20 = vsel %vm266_vm3, 1, %v937_v2  ;;  %v279_v21 = vsel %vm278_vm4, 1, %v937_v2  ;;  %372 = vperm.xlu1 %793, %v294_v4  }
  0x26   : > { %v271_v22 = vrot.slane %v1057_v20, %v1048_v15  ;;  %v275_v23 = vrot.slane %v1057_v20, %v1050_v16  ;;  %v283_v24 = vrot.slane %v279_v21, %v1048_v15  ;;  %v287_v25 = vrot.slane %v279_v21, %v1050_v16 }
  0x27   : > { %338 = vperm.xlu0 %794, %v292_v26   ;;  %v736_v38 = vcvt.f32.s32 %v735_v37 }
  0x28   : > { %vm1114_vm8 = vcmp.eq.s32.totalorder %v283_v24, 1  ;;  %vm1118_vm9 = vcmp.eq.s32.totalorder %v287_v25, 1  ;;  %vm1122_vm10 = vcmp.eq.s32.totalorder %v271_v22, 1  ;;  %vm1126_vm11 = vcmp.eq.s32.totalorder %v275_v23, 1 }
  0x29   : > { %795 = vset.pattern.permute.xlu1 %v936_v1  ;;  %505 = vst.msk [vmem:[%s1107_s10] sm:$0x3] %vm503_vm7, %v736_v38 }
  0x2a   : > { %v807_v27 = vpop.eup %806  ;;  %351 = vperm.xlu1 %795, %v293_v19  }
  0x2b   : > { %v435_v29 = vmul.f32 %v807_v27, %v1041_v12  ;;  %799 = vset.pattern.permute.xlu0 %v936_v1 }
  0x2c   : > { %419 = vperm.xlu0 %799, %v297_v30  }
  0x2d   : > { %v437_v31 = vsel %vm436_vm5, %v1041_v12, %v435_v29 }
  0x2e   : > { %v440_v32 = vsel %vm438_vm6, %v439_v28, %v437_v31  ;;  %796 = vset.pattern.permute.xlu1 %v937_v2 }
  0x2f   : > { %v1081_v33 = vrot.slane %v440_v32, %v1048_v15  ;;  %v1084_v34 = vrot.slane %v440_v32, %v1050_v16  ;;  %361 = vperm.xlu1 %796, %v293_v19  }
  0x30   : > { %317 = vperm.xlu0 %799, %v291_v35  }
  0x33   : > { %797 = vset.pattern.permute.xlu1 %v936_v1 }
  0x34   : > { %334 = vperm.xlu1 %797, %v292_v26   ;;  %803 = vset.pattern.permute.xlu0 %v937_v2 }
  0x35   : > { %327 = vperm.xlu0 %803, %v291_v35  }
  0x38   : > { %798 = vset.pattern.permute.xlu1 %v937_v2 }
  0x39   : > { %344 = vperm.xlu1 %798, %v292_v26   ;;  %310 = vperm.xlu0 %803, %v290_v36  }
  0x3d   : > { %800 = vset.pattern.permute.xlu1 %v938_v10 }
  0x3e   : > { %423 = vperm.xlu1 %800, %v297_v30  }
  0x42   : > { %801 = vset.pattern.permute.xlu1 %v937_v2 }
  0x43   : > { %429 = vperm.xlu1 %801, %v297_v30  }
  0x47   : > { %802 = vset.pattern.permute.xlu1 %v938_v10 }
  0x48   : > { %321 = vperm.xlu1 %802, %v291_v35  }
  0x4c   : > { %804 = vset.pattern.permute.xlu1 %v936_v1 }
  0x4d   : > { %300 = vperm.xlu1 %804, %v290_v36  }
  0x51   : > { %805 = vset.pattern.permute.xlu1 %v938_v10 }
  0x52   : > { %304 = vperm.xlu1 %805, %v290_v36  }
  0x90   : > { %v413_v41 = vpop.permute.xlu1 %412  ;;  %v403_v42 = vpop.permute.xlu0 %402 }
  0x95   : > { %v386_v43 = vpop.permute.xlu1 %385  ;;  %v396_v44 = vpop.permute.xlu0 %395 }
  0x99   : > { %v379_v47 = vpop.permute.xlu0 %378 }
  0x9a   : > { %v390_v50 = vpop.permute.xlu1 %389 }
  0x9b   : > { %v392_v51 = vsel %vm1114_vm8, %v386_v43, %v390_v50  ;;  %v393_v52 = vsel %vm1118_vm9, %v386_v43, %v390_v50 }
  0x9c   : > { %v398_v53 = vsel %vm1122_vm10, %v396_v44, %v392_v51  ;;  %v399_v54 = vsel %vm1126_vm11, %v396_v44, %v393_v52 }
  0x9e   : > { %v407_v55 = vpop.permute.xlu0 %406 }
  0x9f   : > { %v409_v56 = vsel %vm1114_vm8, %v403_v42, %v407_v55  ;;  %v410_v57 = vsel %vm1118_vm9, %v403_v42, %v407_v55  ;;  %v369_v58 = vpop.permute.xlu1 %368 }
  0xa0   : > { %v415_v59 = vsel %vm1122_vm10, %v413_v41, %v409_v56  ;;  %v416_v60 = vsel %vm1126_vm11, %v413_v41, %v410_v57 }
  0xa1   : > { %v452_v61 = vmul.f32 %v1081_v33, %v415_v59  ;;  %v453_v62 = vmul.f32 %v1084_v34, %v416_v60 }
  0xa2   : > { %v356_v17 = vpop.permute.xlu0 %355 }
  0xa3   : > { %v454_v63 = vadd.f32 %v452_v61, %v398_v53  ;;  %v455_v0 = vadd.f32 %v453_v62, %v399_v54 }
  0xa4   : > { %v373_v1 = vpop.permute.xlu1 %372 }
  0xa5   : > { %v375_v3 = vsel %vm1114_vm8, %v369_v58, %v373_v1  ;;  %v376_v4 = vsel %vm1118_vm9, %v369_v58, %v373_v1  ;;  %v456_v5 = vmul.f32 %v454_v63, %v1081_v33  ;;  %v457_v6 = vmul.f32 %v455_v0, %v1084_v34 }
  0xa6   : > { %v381_v7 = vsel %vm1122_vm10, %v379_v47, %v375_v3  ;;  %v382_v8 = vsel %vm1126_vm11, %v379_v47, %v376_v4  ;;  %v339_v28 = vpop.permute.xlu0 %338 }
  0xa7   : > { %v458_v9 = vadd.f32 %v456_v5, %v381_v7  ;;  %v459_v10 = vadd.f32 %v457_v6, %v382_v8 }
  0xa9   : > { %v352_v11 = vpop.permute.xlu1 %351  ;;  %v460_v13 = vmul.f32 %v458_v9, %v1081_v33  ;;  %v461_v14 = vmul.f32 %v459_v10, %v1084_v34 }
  0xaa   : > { %v358_v18 = vsel %vm1114_vm8, %v352_v11, %v356_v17  ;;  %v359_v19 = vsel %vm1118_vm9, %v352_v11, %v356_v17 }
  0xae   : > { %v362_v20 = vpop.permute.xlu1 %361 }
  0xaf   : > { %v364_v21 = vsel %vm1122_vm10, %v362_v20, %v358_v18  ;;  %v365_v22 = vsel %vm1126_vm11, %v362_v20, %v359_v19 }
  0xb0   : > { %v462_v23 = vadd.f32 %v460_v13, %v364_v21  ;;  %v463_v24 = vadd.f32 %v461_v14, %v365_v22 }
  0xb2   : > { %v464_v25 = vmul.f32 %v462_v23, %v1081_v33  ;;  %v465_v26 = vmul.f32 %v463_v24, %v1084_v34  ;;  %v420_v34 = vpop.permute.xlu0 %419 }
  0xb3   : > { %v335_v27 = vpop.permute.xlu1 %334 }
  0xb4   : > { %v341_v29 = vsel %vm1114_vm8, %v335_v27, %v339_v28  ;;  %v342_v30 = vsel %vm1118_vm9, %v335_v27, %v339_v28 }
  0xb6   : > { %v318_v42 = vpop.permute.xlu0 %317 }
  0xb8   : > { %v345_v31 = vpop.permute.xlu1 %344 }
  0xb9   : > { %v347_v32 = vsel %vm1122_vm10, %v345_v31, %v341_v29  ;;  %v348_v35 = vsel %vm1126_vm11, %v345_v31, %v342_v30 }
  0xba   : > { %v466_v36 = vadd.f32 %v464_v25, %v347_v32  ;;  %v467_v37 = vadd.f32 %v465_v26, %v348_v35  ;;  %v328_v54 = vpop.permute.xlu0 %327 }
  0xbc   : > { %v468_v33 = vmul.f32 1.442695, %v466_v36  ;;  %v470_v38 = vmul.f32 1.442695, %v467_v37 }
  0xbd   : > { %v424_v41 = vpop.permute.xlu1 %423 }
  0xbe   : > { %808 = vpow2.f32 %v468_v33  ;;  %v426_v43 = vsel %vm1114_vm8, %v420_v34, %v424_v41  ;;  %v427_v44 = vsel %vm1118_vm9, %v420_v34, %v424_v41  ;;  %v311_v3 = vpop.permute.xlu0 %310 }
  0xbf   : > { %810 = vpow2.f32 %v470_v38 }
  0xc2   : > { %v430_v47 = vpop.permute.xlu1 %429 }
  0xc3   : > { %v432_v50 = vsel %vm1122_vm10, %v430_v47, %v426_v43  ;;  %v433_v51 = vsel %vm1126_vm11, %v430_v47, %v427_v44 }
  0xc4   : > { %vm1189_vm12 = vcmp.lt.f32.partialorder %v480_v39, %v432_v50  ;;  %vm1196_vm13 = vcmp.lt.f32.partialorder %v484_v40, %v433_v51 }
  0xc5   : > { %vm489_vm14 = vmpackc.low %vm1189_vm12, %vm1189_vm12 }
  0xc6   : > { %vm490_vm15 = vmpackc.even %vm489_vm14, %vm489_vm14 }
  0xc7   : > { %vm491_vm0 = vmpackc.low %vm1196_vm13, %vm1196_vm13  ;;  %v493_v15 = vsel %vm490_vm15, 16843009, %v937_v2  ;;  %v322_v39 = vpop.permute.xlu1 %321 }
  0xc8   : > { %v809_v55 = vpop.eup %808  ;;  %vm492_vm1 = vmpackc.even %vm491_vm0, %vm491_vm0  ;;  %v495_v12 = vunpack.c.0.s8 %v493_v15  ;;  %v324_v16 = vsel %vm1114_vm8, %v318_v42, %v322_v39  ;;  %v325_v40 = vsel %vm1118_vm9, %v318_v42, %v322_v39 }
  0xc9   : > { %v811_v56 = vpop.eup %810  ;;  %v494_v57 = vsel %vm492_vm1, 16843009, %v937_v2  ;;  %v330_v58 = vsel %vm1122_vm10, %v328_v54, %v324_v16  ;;  %v331_v59 = vsel %vm1126_vm11, %v328_v54, %v325_v40 }
  0xca   : > { %v496_v60 = vunpack.c.0.s8 %v494_v57  ;;  %v472_v61 = vmul.f32 %v809_v55, %v330_v58  ;;  %v473_v62 = vmul.f32 %v811_v56, %v331_v59 }
  0xcc   : > { %v497_v63 = vpack.c.b16 %v496_v60, %v495_v12  ;;  %v301_v0 = vpop.permute.xlu1 %300 }
  0xce   : > { %v498_v1 = vpack.c.b8 %v497_v63, %v497_v63 }
  0xd0   : > { %499 = vst [vmem:[%s1217_s13] sm:$0xf] %v498_v1 }
  0xd1   : > { %v305_v2 = vpop.permute.xlu1 %304  ;;  %527 = sbr.rel (!%p1008_p5) target bundleno = 243 (0xf3), region = 32 }
  0xd2   : > { %v307_v4 = vsel %vm1114_vm8, %v301_v0, %v305_v2  ;;  %v308_v5 = vsel %vm1118_vm9, %v301_v0, %v305_v2 }
  0xd3   : > { %v313_v6 = vsel %vm1122_vm10, %v311_v3, %v307_v4  ;;  %v314_v7 = vsel %vm1126_vm11, %v311_v3, %v308_v5 }
  0xd4   : > { %v474_v8 = vadd.f32 %v472_v61, %v313_v6  ;;  %v475_v9 = vadd.f32 %v473_v62, %v314_v7 }
  0xd6   : > { %v506_v10 = vsel %vm1189_vm12, %v474_v8, 0.0  ;;  %v507_v11 = vsel %vm1196_vm13, %v475_v9, 0.0 }
  0xd7   : > { %508 = vst [vmem:[%s1233_s22] sm:$0xff] %v506_v10  ;;  %509 = vst [vmem:[%s1233_s22 + $0x8] sm:$0xff] %v507_v11 }
  0xd8   : > { %s1397_s28 = smov (!%p530_p11, %s529_s28), 2 }
  0xd9   : > { %s1245_s30 = sshll.u32 %s1397_s28, 5 }
  0xda   : > { %s534_s5 = ssub.s32 64, %s1245_s30 }
  0xdb   : > { %535 = vsyncadd %s511_s23, %s534_s5  ;;  %p716_p12 = scmp.ne.s32.totalorder %s1245_s30, 0  ;;  %s732_s6 = sshll.u32 %s989_s19, 6 }
  0xdc   : > { %s1255_s11 = scalar_lea.hbm %s1373_s2, %s732_s6  ;;  %s541_s12 = sshll.u32 %s1217_s13, 4  ;;  %s542_s12 = int_to_ptr.vmem [resolvable:$true] %s541_s12 }
  0xdd   : > { %s812_s14 = scalar_lea.vmem %s542_s12, %s1245_s30  ;;  %s940_s28 = smov [#allocation2]  }
  0xde   : > { %p813_p13 = scmp.ne.s32.totalorder %s542_s12, %s812_s14  ;;  %s816_s5 = sshll.u32 %s940_s28, 4  ;;  %s817_s5 = int_to_ptr.vmem [resolvable:$false] %s816_s5 }
  0xdf   : > { %s818_s20 = scalar_lea.vmem %s817_s5, 128  ;;  %p819_p2 = scmp.lt.s32.totalorder %s542_s12, %s817_s5 }
  0xe0   : > { %p814_p0 = pnand %p813_p13, %p716_p12  ;;  %p820_p3 = scmp.lt.s32.totalorder %s818_s20, %s812_s14 }
  0xe2   : > { %p815_p1 = pneg %p814_p0  ;;  %p821_p4 = por %p820_p3, %p819_p2 }
  0xe4   : > { %p822_p7 = pnand %p821_p4, %p815_p1 }
  0xe6   : > { %825 = shalt.err (!%p822_p7)
}
  0xe7   : > { %s826_s13 = scalar_lea.hbm %s1255_s11, %s1245_s30  ;;  %s830_s9 = scalar_lea.hbm %s1373_s2, 96 }
  0xe8   : > { %p827_p8 = scmp.ne.s32.totalorder %s1255_s11, %s826_s13  ;;  %p831_p11 = scmp.lt.u32.totalorder %s1255_s11, %s1373_s2 }
  0xe9   : > { %p832_p13 = scmp.lt.u32.totalorder %s830_s9, %s826_s13  ;;  %p834_p1 = scmp.lt.u32.totalorder %s826_s13, %s1255_s11 }
  0xea   : > { %p828_p9 = pnand %p827_p8, %p716_p12 }
  0xeb   : > { %p833_p0 = por %p832_p13, %p831_p11 }
  0xec   : > { %p829_p10 = pneg %p828_p9 }
  0xed   : > { %p835_p2 = por %p834_p1, %p833_p0 }
  0xef   : > { %p836_p3 = pnand %p835_p2, %p829_p10 }
  0xf1   : > { %839 = shalt.err (!%p836_p3)
}
  0xf2   : > { %544 = dma.vmem_to_hbm [thread:$0]  (%p716_p12), %s542_s12, %s1245_s30, %s1255_s11, %s511_s23  }
  0xf3 PF: > { %547 = sbr.rel (!%p1008_p5) target bundleno = 277 (0x115), region = 36  ;;  %s549_s14 = ssub.s32 (%p1008_p5), 3, %s1024_s29 }
  0xf4   : > { %p550_p4 = scmp.lt.s32.totalorder (%p1008_p5), %s549_s14, 2 }
  0xfa   : > { %s1399_s14 = smov (!%p550_p4, %s549_s14), 2 }
  0xfb   : > { %s1283_s5 = sshll.u32 %s1399_s14, 4 }
  0xfc   : > { %s554_s13 = ssub.s32 32, %s1283_s5 }
  0xfd   : > { %555 = vsyncadd %s1240_s27, %s554_s13  ;;  %p722_p12 = scmp.ne.s32.totalorder %s1283_s5, 0  ;;  %s733_s8 = sshll.u32 %s989_s19, 5 }
  0xfe   : > { %s1292_s11 = scalar_lea.hbm %s1374_s3, %s733_s8  ;;  %s560_s12 = sshll.u32 %s1107_s10, 4  ;;  %s561_s12 = int_to_ptr.vmem [resolvable:$true] %s560_s12 }
  0xff   : > { %s840_s6 = scalar_lea.vmem %s561_s12, %s1283_s5  ;;  %s941_s7 = smov [#allocation4]  }
 0x100   : > { %p841_p7 = scmp.ne.s32.totalorder %s561_s12, %s840_s6  ;;  %s844_s9 = sshll.u32 %s941_s7, 4  ;;  %s845_s9 = int_to_ptr.vmem [resolvable:$false] %s844_s9 }
 0x101   : > { %s846_s28 = scalar_lea.vmem %s845_s9, 64  ;;  %p847_p10 = scmp.lt.s32.totalorder %s561_s12, %s845_s9 }
 0x102   : > { %p842_p8 = pnand %p841_p7, %p722_p12  ;;  %p848_p11 = scmp.lt.s32.totalorder %s846_s28, %s840_s6 }
 0x104   : > { %p843_p9 = pneg %p842_p8  ;;  %p849_p13 = por %p848_p11, %p847_p10 }
 0x106   : > { %p850_p0 = pnand %p849_p13, %p843_p9 }
 0x108   : > { %853 = shalt.err (!%p850_p0)
}
 0x109   : > { %s854_s10 = scalar_lea.hbm %s1292_s11, %s1283_s5  ;;  %s858_s13 = scalar_lea.hbm %s1374_s3, 48 }
 0x10a   : > { %p855_p1 = scmp.ne.s32.totalorder %s1292_s11, %s854_s10  ;;  %p859_p4 = scmp.lt.u32.totalorder %s1292_s11, %s1374_s3 }
 0x10b   : > { %p860_p7 = scmp.lt.u32.totalorder %s858_s13, %s854_s10  ;;  %p862_p9 = scmp.lt.u32.totalorder %s854_s10, %s1292_s11 }
 0x10c   : > { %p856_p2 = pnand %p855_p1, %p722_p12 }
 0x10d   : > { %p861_p8 = por %p860_p7, %p859_p4 }
 0x10e   : > { %p857_p3 = pneg %p856_p2 }
 0x10f   : > { %p863_p10 = por %p862_p9, %p861_p8 }
 0x111   : > { %p864_p11 = pnand %p863_p10, %p857_p3 }
 0x113   : > { %867 = shalt.err (!%p864_p11)
}
 0x114   : > { %563 = dma.vmem_to_hbm [thread:$0]  (%p722_p12), %s561_s12, %s1283_s5, %s1292_s11, %s1240_s27  }
 0x115 PF: > { %566 = sbr.rel (!%p1008_p5) target bundleno = 311 (0x137), region = 40  ;;  %s568_s30 = ssub.s32 (%p1008_p5), 3, %s1024_s29 }
 0x116   : > { %p569_p13 = scmp.lt.s32.totalorder (%p1008_p5), %s568_s30, 2 }
 0x11c   : > { %s1401_s30 = smov (!%p569_p13, %s568_s30), 2 }
 0x11d   : > { %s1319_s6 = sshll.u32 %s1401_s30, 7 }
 0x11e   : > { %s573_s7 = ssub.s32 256, %s1319_s6 }
 0x11f   : > { %574 = vsyncadd %s1240_s27, %s573_s7  ;;  %p726_p12 = scmp.ne.s32.totalorder %s1319_s6, 0  ;;  %s734_s5 = sshll.u32 %s989_s19, 8 }
 0x120   : > { %s1328_s12 = scalar_lea.hbm %s1375_s4, %s734_s5  ;;  %s580_s29 = sshll.u32 %s1233_s22, 4  ;;  %s581_s29 = int_to_ptr.vmem [resolvable:$true] %s580_s29 }
 0x121   : > { %s868_s9 = scalar_lea.vmem %s581_s29, %s1319_s6  ;;  %s942_s28 = smov [#allocation6]  }
 0x122   : > { %p869_p5 = scmp.ne.s32.totalorder %s581_s29, %s868_s9  ;;  %s872_s10 = sshll.u32 %s942_s28, 4  ;;  %s873_s10 = int_to_ptr.vmem [resolvable:$false] %s872_s10 }
 0x123   : > { %s874_s20 = scalar_lea.vmem %s873_s10, 512  ;;  %p875_p2 = scmp.lt.s32.totalorder %s581_s29, %s873_s10 }
 0x124   : > { %p870_p0 = pnand %p869_p5, %p726_p12  ;;  %p876_p3 = scmp.lt.s32.totalorder %s874_s20, %s868_s9 }
 0x126   : > { %p871_p1 = pneg %p870_p0  ;;  %p877_p4 = por %p876_p3, %p875_p2 }
 0x128   : > { %p878_p7 = pnand %p877_p4, %p871_p1 }
 0x12a   : > { %881 = shalt.err (!%p878_p7)
}
 0x12b   : > { %s882_s19 = scalar_lea.hbm %s1328_s12, %s1319_s6  ;;  %s886_s13 = scalar_lea.hbm %s1375_s4, 384 }
 0x12c   : > { %p883_p8 = scmp.ne.s32.totalorder %s1328_s12, %s882_s19  ;;  %p887_p11 = scmp.lt.u32.totalorder %s1328_s12, %s1375_s4 }
 0x12d   : > { %p888_p13 = scmp.lt.u32.totalorder %s886_s13, %s882_s19  ;;  %p890_p0 = scmp.lt.u32.totalorder %s882_s19, %s1328_s12 }
 0x12e   : > { %p884_p9 = pnand %p883_p8, %p726_p12 }
 0x12f   : > { %p889_p5 = por %p888_p13, %p887_p11 }
 0x130   : > { %p885_p10 = pneg %p884_p9 }
 0x131   : > { %p891_p1 = por %p890_p0, %p889_p5 }
 0x133   : > { %p892_p2 = pnand %p891_p1, %p885_p10 }
 0x135   : > { %895 = shalt.err (!%p892_p2)
}
 0x136   : > { %583 = dma.vmem_to_hbm [thread:$0]  (%p726_p12), %s581_s29, %s1319_s6, %s1328_s12, %s1240_s27  }
 0x137 PF: > { %p750_p3 = scmp.ge.s32.totalorder %s934_s18, 2  ;;  %s592_s30 = sand.u32 1, %s922_s15  }
 0x138   : > { %s593_s7 = scalar_lea.sflag [#allocation3], %s592_s30 }
 0x139   : > { %p741_p4 = pnand %p750_p3, %p1012_p6 }
 0x13b   : > { %913 = dma.done.wait (!%p741_p4), %s593_s7, 64  }
 0x13c   : > { %915 = vsyncadd (!%p741_p4), %s593_s7, 4294967232  ;;  %s1391_s5 = sadd.s32 4294967294, %s934_s18  }
 0x13d   : > { %s601_s11 = sand.u32 1, %s1391_s5  }
 0x13e   : > { %s602_s25 = scalar_lea.sflag [#allocation5], %s601_s11 }
 0x13f   : > { %917 = dma.done.wait (!%p741_p4), %s602_s25, 288  }
 0x140   : > { %919 = vsyncadd (!%p741_p4), %s602_s25, 4294967008  ;;  %p18_p12 = scmp.ge.s32.totalorder %s993_s21, 4   ;;  %s1392_s15 = smov %s926_s16 }
 0x141   : > { %s1393_s16 = smov %s930_s17  ;;  %s1394_s17 = smov %s1006_s24 }
 0x142   : > { %s1395_s18 = smov %s993_s21  ;;  %20 = sbr.rel (!%p18_p12) target bundleno = 5 (0x5), region = 97 }
 0x149   :  { %616 = vsyncpa [#allocation3], 1 }
 0x14a   :  { %618 = vsyncpa [#allocation3 + $0x1], 1 }
 0x14b   :  { %619 = vsyncpa [#allocation5], 1 }
 0x14c   :  { %621 = vsyncpa [#allocation5 + $0x1], 1 }

</bundles_post_ra>
